<compile_context>
chip_gen: v7x
topology: tpu7x:2x2x1
jax: 0.10.0
libtpu: 0.0.40
codegen_flags: <defaults>
</compile_context>

<pallas_src>
import jax
import jax.numpy as jnp
from jax.experimental import pallas as pl
from jax.experimental.pallas import tpu as pltpu


# ----------------------------- DDPM schedules ------------------------------
def ddpm_schedules(beta1, beta2, T):
    assert beta1 < beta2 < 1.0, "beta1 and beta2 must be in (0, 1)"
    beta_t = (beta2 - beta1) * jnp.arange(0, T + 1, dtype=jnp.float32) / T + beta1
    sqrt_beta_t = jnp.sqrt(beta_t)
    alpha_t = 1.0 - beta_t
    log_alpha_t = jnp.log(alpha_t)
    alphabar_t = jnp.exp(jnp.cumsum(log_alpha_t))
    sqrtab = jnp.sqrt(alphabar_t)
    oneover_sqrta = 1.0 / jnp.sqrt(alpha_t)
    sqrtmab = jnp.sqrt(1.0 - alphabar_t)
    mab_over_sqrtmab_inv = (1.0 - alpha_t) / sqrtmab
    return {
        "alpha_t": alpha_t,
        "oneover_sqrta": oneover_sqrta,
        "sqrt_beta_t": sqrt_beta_t,
        "alphabar_t": alphabar_t,
        "sqrtab": sqrtab,
        "sqrtmab": sqrtmab,
        "mab_over_sqrtmab": mab_over_sqrtmab_inv,
    }


# --------------------------- batch-tile selection ---------------------------
def _pick_batch_tile(B, C, HW, HID, itemsize=4, vmem_budget=12 * 1024 * 1024):
    """Largest divisor of B whose per-step working set fits a VMEM budget
    (safe for v7x's 64 MiB physical VMEM with a 32 MiB scoped limit)."""
    best = 1
    for tb in range(1, B + 1):
        if B % tb:
            continue
        n = tb * HW
        need = (2 * 2 * C * n          # x + noise blocks, double-buffered
                + tb * n               # resident per-sample indicator
                + (16 + HID) * n       # expanded aux (bias/sa/sm rows)
                + 2 * HID * n          # h intermediate (+ headroom)
                + 2 * C * n            # x_t / eps intermediates
                ) * itemsize
        if need <= vmem_budget:
            best = tb
    return best


# ------------------------------ Pallas kernel -------------------------------
def ddpm_forward_pallas(x_cm, noise_cm, sa, sm, cond_bias, w1t, w2t, b2,
                        *, batch_tile=None):
    """Fused DDPM training forward (batched channel-major layout).

    x_cm, noise_cm : (C, B*HW) float32   NCHW -> channel-major, pixels on lanes
    sa, sm         : (B,)      float32   sqrtab[_ts], sqrtmab[_ts]
    cond_bias      : (HID, B)  float32   b1 + class/time conditioning, per sample
    w1t            : (HID, C)            denoiser first layer  (h = w1t @ x_t)
    w2t            : (C, HID)            denoiser second layer (eps = w2t @ h)
    b2             : (C, 1)
    returns scalar MSE loss (mean over B*C*HW elements).
    """
    C, BHW = x_cm.shape
    B = int(sa.shape[0])
    HW = BHW // B
    HID = int(cond_bias.shape[0])
    assert HID % 8 == 0, "HID must be a multiple of 8 (sublane tile)"

    TB = _pick_batch_tile(B, C, HW, HID) if batch_tile is None else batch_tile
    assert B % TB == 0, "batch_tile must divide B"
    n_steps = B // TB
    N = TB * HW                              # lane width of one batch tile
    AUX = 16 + HID                           # sa row 0, sm row 8, bias rows 16:16+HID
    inv_total = 1.0 / float(B * C * HW)

    # Per-step per-sample aux slab (tile-aligned rows so in-kernel slices are
    # sublane-tile aligned): row 0 = sqrtab, row 8 = sqrtmab, rows 16: = bias.
    aux_full = jnp.zeros((AUX, B), jnp.float32)
    aux_full = aux_full.at[0].set(sa.astype(jnp.float32))
    aux_full = aux_full.at[8].set(sm.astype(jnp.float32))
    aux_full = aux_full.at[16:16 + HID].set(cond_bias.astype(jnp.float32))
    aux_t = aux_full.reshape(AUX, n_steps, TB).transpose(1, 0, 2)   # (n_steps, AUX, TB)

    # Constant within-tile indicator: ind[j, b*HW + hw] = 1 if b == j.
    # One small MXU dot with this expands every per-sample value across HW.
    ind = jnp.repeat(jnp.eye(TB, dtype=jnp.float32), HW, axis=1)    # (TB, N)

    def kernel(x_ref, n_ref, aux_ref, ind_ref, w1t_ref, w2t_ref, b2_ref,
               part_ref):
        ind_v = ind_ref[...]                                        # (TB, N)

        # Expand per-sample scalars / bias across the pixel axis on the MXU.
        exp = jnp.dot(aux_ref[0], ind_v,
                      preferred_element_type=jnp.float32)           # (AUX, N)
        sa_row = exp[0:1, :]                                        # (1, N)
        sm_row = exp[8:9, :]                                        # (1, N)
        bias = exp[16:16 + HID, :]                                  # (HID, N)

        x = x_ref[...]                                              # (C, N)
        n = n_ref[...]                                              # (C, N)

        # forward-diffusion noising, whole batch tile in one VPU pass
        x_t = sa_row * x + sm_row * n                               # (C, N)

        # conditional per-pixel MLP denoiser: two batched MXU matmuls
        h = jnp.dot(w1t_ref[...], x_t,
                    preferred_element_type=jnp.float32) + bias      # (HID, N)
        h = jnp.maximum(h, 0.0)
        eps = jnp.dot(w2t_ref[...], h,
                      preferred_element_type=jnp.float32) + b2_ref[...]  # (C, N)

        # per-step partial sum of squared error (reduced in the wrapper)
        diff = n - eps
        part_ref[...] = jnp.zeros((1, 1, 1), jnp.float32) + jnp.sum(diff * diff)

    partials = pl.pallas_call(
        kernel,
        out_shape=jax.ShapeDtypeStruct((n_steps, 1, 1), jnp.float32),
        grid_spec=pltpu.PrefetchScalarGridSpec(
            num_scalar_prefetch=0,
            grid=(n_steps,),
            in_specs=[
                pl.BlockSpec((C, N), lambda s: (0, s)),             # x (batched slab)
                pl.BlockSpec((C, N), lambda s: (0, s)),             # noise
                pl.BlockSpec((1, AUX, TB), lambda s: (s, 0, 0)),    # per-sample aux
                pl.BlockSpec((TB, N), lambda s: (0, 0)),            # indicator (resident)
                pl.BlockSpec((HID, C), lambda s: (0, 0)),           # w1t (resident)
                pl.BlockSpec((C, HID), lambda s: (0, 0)),           # w2t (resident)
                pl.BlockSpec((C, 1), lambda s: (0, 0)),             # b2  (resident)
            ],
            out_specs=pl.BlockSpec((1, 1, 1), lambda s: (s, 0, 0)), # per-step partial
        ),
        compiler_params=pltpu.CompilerParams(
            # each step owns its inputs/output block -> batch axis is parallel
            # (megacore-shardable on v7x); final reduce happens in the wrapper.
            dimension_semantics=("parallel",),
            vmem_limit_bytes=32 * 1024 * 1024,
        ),
    )(x_cm, noise_cm, aux_t, ind, w1t, w2t, b2)

    return jnp.sum(partials) * inv_total


# ------------------------------ pure-JAX reference --------------------------
def ddpm_forward_ref(x, noise, sa, sm, cond_bias, w1t, w2t, b2):
    B, C = x.shape[:2]
    x3 = x.reshape(B, C, -1)
    n3 = noise.reshape(B, C, -1)
    x_t = sa[:, None, None] * x3 + sm[:, None, None] * n3
    h = jnp.maximum(jnp.einsum("hc,bcx->bhx", w1t, x_t)
                    + cond_bias.T[:, :, None], 0.0)
    eps = jnp.einsum("ch,bhx->bcx", w2t, h) + b2[None]
    return jnp.mean((n3 - eps) ** 2)


# ----------------------------------- main -----------------------------------
if __name__ == "__main__":
    # small shapes consistent with the module's forward (x: NCHW, c: class ids)
    B, C, H, W = 2, 4, 16, 16
    HW = H * W
    HID = 32
    N_CLASSES = 10
    N_T = 400
    DROP_PROB = 0.1
    BETAS = (1e-4, 0.02)

    key = jax.random.PRNGKey(0)
    (k_x, k_c, k_ts, k_noise, k_mask,
     k_w1, k_w2, k_emb, k_tw) = jax.random.split(key, 9)

    # module inputs
    x = jax.random.normal(k_x, (B, C, H, W), jnp.float32)        # NCHW like PyTorch
    c = jax.random.randint(k_c, (B,), 0, N_CLASSES)              # class labels

    # DDPM buffers
    sched = ddpm_schedules(BETAS[0], BETAS[1], N_T)

    # training-time randomness (torch.randint / randn_like / bernoulli)
    _ts = jax.random.randint(k_ts, (B,), 1, N_T + 1)
    noise = jax.random.normal(k_noise, (B, C, H, W), jnp.float32)
    context_mask = jax.random.bernoulli(k_mask, DROP_PROB, (B,)).astype(jnp.float32)

    # deterministic synthetic denoiser parameters (channel-major form)
    w1t = 0.1 * jax.random.normal(k_w1, (HID, C), jnp.float32)
    b1 = jnp.zeros((HID, 1), jnp.float32)
    w2t = 0.1 * jax.random.normal(k_w2, (C, HID), jnp.float32)
    b2 = jnp.zeros((C, 1), jnp.float32)
    class_emb = 0.1 * jax.random.normal(k_emb, (N_CLASSES, HID), jnp.float32)
    time_w = 0.1 * jax.random.normal(k_tw, (HID,), jnp.float32)

    # per-sample noising coefficients
    sa = sched["sqrtab"][_ts].astype(jnp.float32)                # (B,)
    sm = sched["sqrtmab"][_ts].astype(jnp.float32)               # (B,)

    # conditioning: class embedding gated by context_mask + time embedding,
    # with b1 folded in (one bias vector per sample).
    t_norm = _ts.astype(jnp.float32) / float(N_T)                # _ts / n_T
    cond = ((1.0 - context_mask)[:, None] * class_emb[c]
            + t_norm[:, None] * time_w[None, :])                 # (B, HID)
    cond_bias = b1 + cond.T                                      # (HID, B)

    # batched channel-major layout: NCHW -> (C, B*HW); one cheap host-side
    # transpose buys fully-batched MXU matmuls inside the kernel.
    x_cm = x.reshape(B, C, HW).transpose(1, 0, 2).reshape(C, B * HW)
    noise_cm = noise.reshape(B, C, HW).transpose(1, 0, 2).reshape(C, B * HW)

    loss = ddpm_forward_pallas(x_cm, noise_cm, sa, sm, cond_bias, w1t, w2t, b2)
    loss = jax.block_until_ready(loss)

    loss_ref = ddpm_forward_ref(x, noise, sa, sm, cond_bias, w1t, w2t, b2)
    loss_ref = jax.block_until_ready(loss_ref)

    assert jnp.isfinite(loss), "loss is not finite"
    assert jnp.allclose(loss, loss_ref, rtol=1e-3, atol=1e-5), (loss, loss_ref)

    print("KERNEL_OK")
</pallas_src>

<mosaic_0001>
module attributes {stable_mosaic.version = 11 : i64} {
  func.func @kernel(%arg0: i32, %arg1: memref<4x512xf32, #tpu.memory_space<vmem>>, %arg2: memref<4x512xf32, #tpu.memory_space<vmem>>, %arg3: memref<1x48x2xf32, #tpu.memory_space<vmem>>, %arg4: memref<2x512xf32, #tpu.memory_space<vmem>>, %arg5: memref<32x4xf32, #tpu.memory_space<vmem>>, %arg6: memref<4x32xf32, #tpu.memory_space<vmem>>, %arg7: memref<4x1xf32, #tpu.memory_space<vmem>>, %arg8: memref<1x1x1xf32, #tpu.memory_space<vmem>>) attributes {dimension_semantics = [#tpu.dimension_semantics<parallel>], iteration_bounds = array<i64: 1>, scalar_prefetch = 0 : i64, scratch_operands = 0 : i64, tpu.core_type = #tpu.core_type<tc>, window_params = [{transform_indices = @transform_0, window_bounds = array<i64: 4, 512>}, {transform_indices = @transform_1, window_bounds = array<i64: 4, 512>}, {transform_indices = @transform_2, window_bounds = array<i64: 1, 48, 2>}, {pipeline_mode = #tpu.pipeline_mode<synchronous>, transform_indices = @transform_3, window_bounds = array<i64: 2, 512>}, {pipeline_mode = #tpu.pipeline_mode<synchronous>, transform_indices = @transform_4, window_bounds = array<i64: 32, 4>}, {pipeline_mode = #tpu.pipeline_mode<synchronous>, transform_indices = @transform_5, window_bounds = array<i64: 4, 32>}, {pipeline_mode = #tpu.pipeline_mode<synchronous>, transform_indices = @transform_6, window_bounds = array<i64: 4, 1>}, {transform_indices = @transform_7, window_bounds = array<i64: 1, 1, 1>}]} {
    %c0 = arith.constant 0 : index
    %c0_0 = arith.constant 0 : index
    %0 = vector.load %arg4[%c0, %c0_0] : memref<2x512xf32, #tpu.memory_space<vmem>>, vector<2x512xf32>
    %c0_1 = arith.constant 0 : index
    %c0_2 = arith.constant 0 : index
    %c0_3 = arith.constant 0 : index
    %1 = vector.load %arg3[%c0_1, %c0_2, %c0_3] : memref<1x48x2xf32, #tpu.memory_space<vmem>>, vector<1x48x2xf32>
    %2 = vector.shape_cast %1 : vector<1x48x2xf32> to vector<48x2xf32>
    %cst = arith.constant dense<0.000000e+00> : vector<48x512xf32>
    %3 = tpu.matmul %2, %0, %cst {dimension_numbers = #tpu.dot_dimension_numbers<[1], [0], [0], [1], [0, 0, 1, 1], [], []>} : vector<48x2xf32>, vector<2x512xf32>, vector<48x512xf32> -> vector<48x512xf32>
    %4 = vector.extract_strided_slice %3 {offsets = [0, 0], sizes = [1, 512], strides = [1, 1]} : vector<48x512xf32> to vector<1x512xf32>
    %5 = vector.extract_strided_slice %3 {offsets = [8, 0], sizes = [1, 512], strides = [1, 1]} : vector<48x512xf32> to vector<1x512xf32>
    %6 = vector.extract_strided_slice %3 {offsets = [16, 0], sizes = [32, 512], strides = [1, 1]} : vector<48x512xf32> to vector<32x512xf32>
    %c0_4 = arith.constant 0 : index
    %c0_5 = arith.constant 0 : index
    %7 = vector.load %arg1[%c0_4, %c0_5] : memref<4x512xf32, #tpu.memory_space<vmem>>, vector<4x512xf32>
    %c0_6 = arith.constant 0 : index
    %c0_7 = arith.constant 0 : index
    %8 = vector.load %arg2[%c0_6, %c0_7] : memref<4x512xf32, #tpu.memory_space<vmem>>, vector<4x512xf32>
    %9 = vector.broadcast %4 : vector<1x512xf32> to vector<4x512xf32>
    %10 = arith.mulf %9, %7 : vector<4x512xf32>
    %11 = vector.broadcast %5 : vector<1x512xf32> to vector<4x512xf32>
    %12 = arith.mulf %11, %8 : vector<4x512xf32>
    %13 = arith.addf %10, %12 : vector<4x512xf32>
    %c0_8 = arith.constant 0 : index
    %c0_9 = arith.constant 0 : index
    %14 = vector.load %arg5[%c0_8, %c0_9] : memref<32x4xf32, #tpu.memory_space<vmem>>, vector<32x4xf32>
    %cst_10 = arith.constant dense<0.000000e+00> : vector<32x512xf32>
    %15 = tpu.matmul %14, %13, %cst_10 {dimension_numbers = #tpu.dot_dimension_numbers<[1], [0], [0], [1], [0, 0, 1, 1], [], []>} : vector<32x4xf32>, vector<4x512xf32>, vector<32x512xf32> -> vector<32x512xf32>
    %16 = arith.addf %15, %6 : vector<32x512xf32>
    %cst_11 = arith.constant 0.000000e+00 : f32
    %17 = vector.broadcast %cst_11 : f32 to vector<32x512xf32>
    %18 = arith.maximumf %16, %17 : vector<32x512xf32>
    %c0_12 = arith.constant 0 : index
    %c0_13 = arith.constant 0 : index
    %19 = vector.load %arg6[%c0_12, %c0_13] : memref<4x32xf32, #tpu.memory_space<vmem>>, vector<4x32xf32>
    %cst_14 = arith.constant dense<0.000000e+00> : vector<4x512xf32>
    %20 = tpu.matmul %19, %18, %cst_14 {dimension_numbers = #tpu.dot_dimension_numbers<[1], [0], [0], [1], [0, 0, 1, 1], [], []>} : vector<4x32xf32>, vector<32x512xf32>, vector<4x512xf32> -> vector<4x512xf32>
    %c0_15 = arith.constant 0 : index
    %c0_16 = arith.constant 0 : index
    %21 = vector.load %arg7[%c0_15, %c0_16] : memref<4x1xf32, #tpu.memory_space<vmem>>, vector<4x1xf32>
    %22 = vector.broadcast %21 : vector<4x1xf32> to vector<4x512xf32>
    %23 = arith.addf %20, %22 : vector<4x512xf32>
    %24 = arith.subf %8, %23 : vector<4x512xf32>
    %cst_17 = arith.constant 0.000000e+00 : f32
    %25 = vector.broadcast %cst_17 : f32 to vector<1x1x1xf32>
    %26 = arith.mulf %24, %24 : vector<4x512xf32>
    %27 = vector.shape_cast %26 : vector<4x512xf32> to vector<1x4x512xf32>
    %cst_18 = arith.constant dense<0.000000e+00> : vector<1xf32>
    %28 = vector.multi_reduction <add>, %27, %cst_18 [1, 2] : vector<1x4x512xf32> to vector<1xf32>
    %29 = vector.shape_cast %28 : vector<1xf32> to vector<1x1x1xf32>
    %30 = vector.extract %29[0, 0, 0] : f32 from vector<1x1x1xf32>
    %31 = vector.broadcast %30 : f32 to vector<1x1x1xf32>
    %32 = arith.addf %25, %31 : vector<1x1x1xf32>
    %c0_19 = arith.constant 0 : index
    %c0_20 = arith.constant 0 : index
    %c0_21 = arith.constant 0 : index
    %33 = vector.load %arg8[%c0_19, %c0_20, %c0_21] : memref<1x1x1xf32, #tpu.memory_space<vmem>>, vector<1x1x1xf32>
    tpu.vector_store %arg8[%c0_19, %c0_20, %c0_21], %32 {strides = array<i32>} : memref<1x1x1xf32, #tpu.memory_space<vmem>>, vector<1x1x1xf32>,
    return
  }
  func.func @transform_0(%arg0: i32) -> (i32, i32) {
    %c0_i32 = arith.constant 0 : i32
    %c0_i32_0 = arith.constant 0 : i32
    return %c0_i32, %arg0 : i32, i32
  }
  func.func @transform_1(%arg0: i32) -> (i32, i32) {
    %c0_i32 = arith.constant 0 : i32
    %c0_i32_0 = arith.constant 0 : i32
    return %c0_i32, %arg0 : i32, i32
  }
  func.func @transform_2(%arg0: i32) -> (i32, i32, i32) {
    %c0_i32 = arith.constant 0 : i32
    %c0_i32_0 = arith.constant 0 : i32
    %c0_i32_1 = arith.constant 0 : i32
    return %arg0, %c0_i32, %c0_i32_0 : i32, i32, i32
  }
  func.func @transform_3(%arg0: i32) -> (i32, i32) {
    %c0_i32 = arith.constant 0 : i32
    %c0_i32_0 = arith.constant 0 : i32
    %c0_i32_1 = arith.constant 0 : i32
    return %c0_i32, %c0_i32_0 : i32, i32
  }
  func.func @transform_4(%arg0: i32) -> (i32, i32) {
    %c0_i32 = arith.constant 0 : i32
    %c0_i32_0 = arith.constant 0 : i32
    %c0_i32_1 = arith.constant 0 : i32
    return %c0_i32, %c0_i32_0 : i32, i32
  }
  func.func @transform_5(%arg0: i32) -> (i32, i32) {
    %c0_i32 = arith.constant 0 : i32
    %c0_i32_0 = arith.constant 0 : i32
    %c0_i32_1 = arith.constant 0 : i32
    return %c0_i32, %c0_i32_0 : i32, i32
  }
  func.func @transform_6(%arg0: i32) -> (i32, i32) {
    %c0_i32 = arith.constant 0 : i32
    %c0_i32_0 = arith.constant 0 : i32
    %c0_i32_1 = arith.constant 0 : i32
    return %c0_i32, %c0_i32_0 : i32, i32
  }
  func.func @transform_7(%arg0: i32) -> (i32, i32, i32) {
    %c0_i32 = arith.constant 0 : i32
    %c0_i32_0 = arith.constant 0 : i32
    %c0_i32_1 = arith.constant 0 : i32
    return %arg0, %c0_i32, %c0_i32_0 : i32, i32, i32
  }
}

</mosaic_0001>

<bundles_post_ra>
// kernel: tpu_custom_call.1
= control target key start
LH: loop header
LB: loop body
LE: loop exit
PB: predicated region body
PF: predicated region fallthrough
CT: control target
= control target key end

     0   :  { %v39_v1 = vlaneseq  ;;  %v869_v2 = vmov 1983009808   ;;  %v870_v4 = vmov 0.0   ;;  %s1038_s0 = inlined_call_operand.vmem [shape: f32[4,512], index: 0, kind: input, shape index: {}]   ;;  %s1039_s1 = inlined_call_operand.vmem [shape: f32[4,512], index: 1, kind: input, shape index: {}]   ;;  %s1040_s2 = inlined_call_operand.vmem [shape: f32[1,48,2], index: 2, kind: input, shape index: {}]   ;;  %s1041_s3 = inlined_call_operand.vmem [shape: f32[2,512], index: 3, kind: input, shape index: {}]   ;;  %s1042_s4 = inlined_call_operand.vmem [shape: f32[32,4], index: 4, kind: input, shape index: {}]   ;;  %s1043_s5 = inlined_call_operand.vmem [shape: f32[4,32], index: 5, kind: input, shape index: {}]   ;;  %s1044_s6 = inlined_call_operand.vmem [shape: f32[4,1], index: 6, kind: input, shape index: {}]   ;;  %s1045_s7 = inlined_call_operand.hbm [shape: f32[1,1,1], index: 7, kind: output, shape index: {}]  }
   0x1   :  { %v27_v0 = vld [vmem:[%s1041_s3] sm:$0xff]  ;;  %v37_v3 = vunpack.c.l.s4 %v869_v2  ;;  %144 = vmatprep.mubr.f32.mxu0 %v870_v4  ;;  %245 = vmatprep.mubr.f32.mxu1 %v870_v4 }
   0x2   :  { %12 = vsyncpa [#allocation3], 0  ;;  %v40_v5 = vshrl.u32 %v39_v1, 7  ;;  %v35_v7 = vcombine.high %v27_v0, %v27_v0  ;;  %vm71_vm0 = vcmask 1041408   ;;  %v28_v13 = vld [vmem:[%s1040_s2] sm:$0xff]  ;;  %vm52_vm1 = vcmask 15360  }
   0x3   :  { %v38_v6 = vunpack.c.0.s8 %v37_v3  ;;  %v29_v14 = vld [vmem:[%s1040_s2 + $0x8] sm:$0xff]  ;;  %v30_v15 = vld [vmem:[%s1040_s2 + $0x10] sm:$0xff]  ;;  %v31_v16 = vld [vmem:[%s1040_s2 + $0x18] sm:$0xff]  ;;  %vm359_vm2 = vcmask 1043456   ;;  %vm346_vm3 = vcmask 31744   ;;  %v871_v61 = vmov 0  }
   0x4   :  { %v32_v17 = vld [vmem:[%s1040_s2 + $0x20] sm:$0xff]  ;;  %v33_v18 = vld [vmem:[%s1040_s2 + $0x28] sm:$0xff]  ;;  %v288_v19 = vsub.s32 0, %v40_v5  ;;  %v344_v58 = vld [vmem:[%s1042_s4 + $0x10] sm:$0xff]  ;;  %839 = vset.pattern.permute.xlu0 %v871_v61  ;;  %vm573_vm4 = vcmask 261120   ;;  %vm755_vm5 = vcmask 0  }
   0x5   :  { %v41_v8 = vsub.s32 %v38_v6, %v40_v5  ;;  %v283_v20 = vld [vmem:[%s1038_s0 + $0x8] sm:$0xff]  ;;  %v282_v23 = vld [vmem:[%s1038_s0] sm:$0xff]  ;;  %v345_v59 = vld [vmem:[%s1042_s4 + $0x18] sm:$0xff] }
   0x6   :  { %v969_v28 = vld [vmem:[%s1039_s1] sm:$0xff]  ;;  %v974_v29 = vld [vmem:[%s1039_s1 + $0x8] sm:$0xff]  ;;  %v305_v32 = vcombine.high %v283_v20, %v283_v20  ;;  %v304_v33 = vcombine.high %v282_v23, %v282_v23 }
   0x7   :  { %v42_v9 = vrot.slane %v27_v0, %v41_v8  ;;  %v49_v10 = vrot.slane %v35_v7, %v41_v8  ;;  %v330_v36 = vcombine.high %v969_v28, %v969_v28  ;;  %v331_v37 = vcombine.high %v974_v29, %v974_v29  ;;  %v342_v56 = vld [vmem:[%s1042_s4] sm:$0xff]  ;;  %v343_v57 = vld [vmem:[%s1042_s4 + $0x8] sm:$0xff] }
   0x8   :  { %v567_v60 = vld [vmem:[%s1044_s6] sm:$0xf] }
   0x9   :  { %v50_v11 = vcombine.high %v42_v9, %v42_v9  ;;  %v51_v12 = vcombine.high %v49_v10, %v49_v10  ;;  %570 = vperm.xlu0 %839, %v567_v60  }
   0xb   :  { %771 = vmatprep.subr.msk.mxu0 %vm71_vm0, %v50_v11  ;;  %779 = vmatprep.subr.msk.mxu1 %vm71_vm0, %v51_v12 }
   0xc   :  { %772 = vmatpush1.msk.msra.mxu0 %vm71_vm0, %v42_v9  ;;  %780 = vmatpush1.msk.msra.mxu1 %vm71_vm0, %v49_v10 }
   0xd   :  { %773 = vmatmul.mubr.msk.f32.vlgmr.msra.gmra.mrb[0].mxu0 %vm52_vm1, %v28_v13  ;;  %781 = vmatmul.mubr.msk.f32.vlgmr.msra.gmra.mrb[0].mxu1 %vm52_vm1, %v28_v13 }
   0xe   :  { %150 = vmatprep.mubr.f32.mxu0 %v870_v4  ;;  %251 = vmatprep.mubr.f32.mxu1 %v870_v4 }
  0x11   :  { %774 = vmatmul.mubr.msk.f32.gmra.mrb[2].mxu0 %vm52_vm1, %v29_v14  ;;  %782 = vmatmul.mubr.msk.f32.gmra.mrb[2].mxu1 %vm52_vm1, %v29_v14 }
  0x12   :  { %156 = vmatprep.mubr.f32.mxu0 %v870_v4  ;;  %257 = vmatprep.mubr.f32.mxu1 %v870_v4 }
  0x15   :  { %775 = vmatmul.mubr.msk.f32.gmra.mrb[4].mxu0 %vm52_vm1, %v30_v15  ;;  %783 = vmatmul.mubr.msk.f32.gmra.mrb[4].mxu1 %vm52_vm1, %v30_v15 }
  0x16   :  { %162 = vmatprep.mubr.f32.mxu0 %v870_v4  ;;  %263 = vmatprep.mubr.f32.mxu1 %v870_v4 }
  0x19   :  { %776 = vmatmul.mubr.msk.f32.gmra.mrb[6].mxu0 %vm52_vm1, %v31_v16  ;;  %784 = vmatmul.mubr.msk.f32.gmra.mrb[6].mxu1 %vm52_vm1, %v31_v16 }
  0x1a   :  { %168 = vmatprep.mubr.f32.mxu0 %v870_v4  ;;  %269 = vmatprep.mubr.f32.mxu1 %v870_v4 }
  0x1d   :  { %777 = vmatmul.mubr.msk.f32.gmra.mrb[8].mxu0 %vm52_vm1, %v32_v17  ;;  %785 = vmatmul.mubr.msk.f32.gmra.mrb[8].mxu1 %vm52_vm1, %v32_v17 }
  0x1e   :  { %174 = vmatprep.mubr.f32.mxu0 %v870_v4  ;;  %275 = vmatprep.mubr.f32.mxu1 %v870_v4 }
  0x21   :  { %778 = vmatmul.mubr.msk.f32.gmra.mrb[10].mxu0 %vm52_vm1, %v33_v18  ;;  %786 = vmatmul.mubr.msk.f32.gmra.mrb[10].mxu1 %vm52_vm1, %v33_v18 }
  0x22   :  { %436 = vmatprep.mubr.f32.mxu0 %v870_v4  ;;  %525 = vmatprep.mubr.f32.mxu1 %v870_v4 }
  0xe0   :  { %v146_v21 = vpop.f32.mrb[0].mxu0  ;;  %v247_v22 = vpop.f32.mrb[0].mxu1 }
  0xe1   :  { %v289_v24 = vrot.slane %v146_v21, %v288_v19  ;;  %v148_v25 = vpop.f32.mrb[1].mxu0  ;;  %v297_v26 = vrot.slane %v247_v22, %v288_v19  ;;  %v249_v27 = vpop.f32.mrb[1].mxu1 }
  0xe2   :  { %v293_v30 = vrot.slane %v148_v25, %v288_v19  ;;  %v301_v31 = vrot.slane %v249_v27, %v288_v19 }
  0xe3   :  { %v310_v38 = vmul.f32 %v297_v26, %v283_v20  ;;  %v308_v46 = vmul.f32 %v289_v24, %v282_v23 }
  0xe4   :  { %v152_v34 = vpop.f32.mrb[2].mxu0  ;;  %v253_v35 = vpop.f32.mrb[2].mxu1  ;;  %v311_v43 = vmul.f32 %v305_v32, %v301_v31  ;;  %v309_v49 = vmul.f32 %v304_v33, %v293_v30 }
  0xe5   :  { %v315_v39 = vrot.slane %v152_v34, %v288_v19  ;;  %v323_v40 = vrot.slane %v253_v35, %v288_v19  ;;  %v154_v41 = vpop.f32.mrb[3].mxu0  ;;  %v255_v42 = vpop.f32.mrb[3].mxu1 }
  0xe6   :  { %v319_v44 = vrot.slane %v154_v41, %v288_v19  ;;  %v327_v45 = vrot.slane %v255_v42, %v288_v19  ;;  %v571_v41 = vpop.permute.xlu0 %570 }
  0xe7   :  { %v334_v47 = vmul.f32 %v315_v39, %v969_v28  ;;  %v336_v48 = vmul.f32 %v323_v40, %v974_v29  ;;  %v566_v40 = vld [vmem:[%s1043_s5] sm:$0xf]  ;;  %s872_s5 = smov [#allocation2]  }
  0xe8   :  { %v335_v50 = vmul.f32 %v330_v36, %v319_v44  ;;  %v337_v51 = vmul.f32 %v331_v37, %v327_v45  ;;  %s763_s28 = sshll.u32 %s872_s5, 4  ;;  %s764_s28 = int_to_ptr.vmem [resolvable:$true] %s763_s28 }
  0xe9   :  { %v338_v52 = vadd.f32 %v334_v47, %v308_v46  ;;  %v340_v53 = vadd.f32 %v336_v48, %v310_v38  ;;  %s845_s30 = scalar_lea.vmem %s764_s28, 16  ;;  %s849_s8 = scalar_lea.vmem %s764_s28, 32 }
  0xea   :  { %v339_v54 = vadd.f32 %v335_v50, %v309_v49  ;;  %v341_v55 = vadd.f32 %v337_v51, %v311_v43  ;;  %p846_p0 = scmp.ne.s32.totalorder %s764_s28, %s845_s30  ;;  %p850_p1 = scmp.lt.s32.totalorder %s764_s28, %s764_s28 }
  0xeb   :  { %p851_p2 = scmp.lt.s32.totalorder %s849_s8, %s845_s30 }
  0xec   :  { %787 = vmatprep.subr.msk.mxu0 %vm359_vm2, %v339_v54  ;;  %793 = vmatprep.subr.msk.mxu1 %vm359_vm2, %v341_v55 }
  0xed   :  { %788 = vmatpush1.msk.msra.mxu0 %vm359_vm2, %v338_v52  ;;  %794 = vmatpush1.msk.msra.mxu1 %vm359_vm2, %v340_v53  ;;  %p852_p3 = por %p851_p2, %p850_p1 }
  0xee   :  { %789 = vmatmul.mubr.msk.f32.vlgmr.msra.gmra.mrb[4].mxu0 %vm346_vm3, %v342_v56  ;;  %795 = vmatmul.mubr.msk.f32.vlgmr.msra.gmra.mrb[4].mxu1 %vm346_vm3, %v342_v56 }
  0xef   :  { %442 = vmatprep.mubr.f32.mxu0 %v870_v4  ;;  %531 = vmatprep.mubr.f32.mxu1 %v870_v4  ;;  %p853_p4 = pnand %p852_p3, %p846_p0 }
  0xf2   :  { %790 = vmatmul.mubr.msk.f32.gmra.mrb[6].mxu0 %vm346_vm3, %v343_v57  ;;  %796 = vmatmul.mubr.msk.f32.gmra.mrb[6].mxu1 %vm346_vm3, %v343_v57 }
  0xf3   :  { %448 = vmatprep.mubr.f32.mxu0 %v870_v4  ;;  %537 = vmatprep.mubr.f32.mxu1 %v870_v4 }
  0xf6   :  { %791 = vmatmul.mubr.msk.f32.gmra.mrb[8].mxu0 %vm346_vm3, %v344_v58  ;;  %797 = vmatmul.mubr.msk.f32.gmra.mrb[8].mxu1 %vm346_vm3, %v344_v58 }
  0xf7   :  { %454 = vmatprep.mubr.f32.mxu0 %v870_v4  ;;  %543 = vmatprep.mubr.f32.mxu1 %v870_v4 }
  0xfa   :  { %792 = vmatmul.mubr.msk.f32.gmra.mrb[10].mxu0 %vm346_vm3, %v345_v59  ;;  %798 = vmatmul.mubr.msk.f32.gmra.mrb[10].mxu1 %vm346_vm3, %v345_v59 }
  0xfb   :  { %641 = vmatprep.mubr.f32.mxu0 %v870_v4  ;;  %712 = vmatprep.mubr.f32.mxu1 %v870_v4 }
 0x1c1   :  { %v438_v62 = vpop.f32.mrb[4].mxu0  ;;  %v527_v63 = vpop.f32.mrb[4].mxu1 }
 0x1c2   :  { %v440_v0 = vpop.f32.mrb[5].mxu0  ;;  %v529_v1 = vpop.f32.mrb[5].mxu1  ;;  %v550_v5 = vmax.f32 %v438_v62, 0.0  ;;  %v552_v6 = vmax.f32 %v527_v63, 0.0 }
 0x1c3   :  { %v551_v4 = vmax.f32 %v440_v0, 0.0  ;;  %v553_v11 = vmax.f32 %v529_v1, 0.0 }
 0x1c5   :  { %v444_v2 = vpop.f32.mrb[6].mxu0  ;;  %v533_v3 = vpop.f32.mrb[6].mxu1 }
 0x1c6   :  { %v554_v7 = vmax.f32 %v444_v2, 0.0  ;;  %v556_v8 = vmax.f32 %v533_v3, 0.0  ;;  %v446_v9 = vpop.f32.mrb[7].mxu0  ;;  %v535_v10 = vpop.f32.mrb[7].mxu1 }
 0x1c7   :  { %v555_v12 = vmax.f32 %v446_v9, 0.0  ;;  %v557_v13 = vmax.f32 %v535_v10, 0.0 }
 0x1c8   :  { %v803_v14 = vpack.c.bf16 %v554_v7, %v550_v5  ;;  %v811_v15 = vpack.c.bf16 %v556_v8, %v552_v6 }
 0x1c9   :  { %v801_v16 = vpack.c.bf16 %v555_v12, %v551_v4  ;;  %v809_v17 = vpack.c.bf16 %v557_v13, %v553_v11  ;;  %v450_v18 = vpop.f32.mrb[8].mxu0  ;;  %v539_v19 = vpop.f32.mrb[8].mxu1 }
 0x1ca   :  { %v452_v20 = vpop.f32.mrb[9].mxu0  ;;  %v541_v21 = vpop.f32.mrb[9].mxu1  ;;  %v558_v24 = vmax.f32 %v450_v18, 0.0  ;;  %v560_v25 = vmax.f32 %v539_v19, 0.0 }
 0x1cb   :  { %802 = vmatprep.subr.bf16.mxu0 %v801_v16  ;;  %810 = vmatprep.subr.bf16.mxu1 %v809_v17  ;;  %v559_v32 = vmax.f32 %v452_v20, 0.0  ;;  %v561_v33 = vmax.f32 %v541_v21, 0.0 }
 0x1cc   :  { %804 = vmatpush1.bf16.msra.mxu0 %v803_v14  ;;  %812 = vmatpush1.bf16.msra.mxu1 %v811_v15 }
 0x1cd   :  { %v456_v22 = vpop.f32.mrb[10].mxu0  ;;  %v545_v23 = vpop.f32.mrb[10].mxu1 }
 0x1ce   :  { %v562_v26 = vmax.f32 %v456_v22, 0.0  ;;  %v564_v27 = vmax.f32 %v545_v23, 0.0  ;;  %v458_v30 = vpop.f32.mrb[11].mxu0  ;;  %v547_v31 = vpop.f32.mrb[11].mxu1 }
 0x1cf   :  { %v563_v34 = vmax.f32 %v458_v30, 0.0  ;;  %v565_v35 = vmax.f32 %v547_v31, 0.0 }
 0x1d0   :  { %v807_v36 = vpack.c.bf16 %v562_v26, %v558_v24  ;;  %v815_v37 = vpack.c.bf16 %v564_v27, %v560_v25 }
 0x1d1   :  { %v805_v38 = vpack.c.bf16 %v563_v34, %v559_v32  ;;  %v813_v39 = vpack.c.bf16 %v565_v35, %v561_v33 }
 0x1d3   :  { %806 = vmatprep.subr.bf16.mxu0 %v805_v38  ;;  %814 = vmatprep.subr.bf16.mxu1 %v813_v39 }
 0x1d4   :  { %808 = vmatpush1.bf16.msra.mxu0 %v807_v36  ;;  %816 = vmatpush1.bf16.msra.mxu1 %v815_v37 }
 0x1d7   :  { %799 = vmatmul.mubr.msk.f32.vlgmr.msra.gmra.mrb[12].mxu0 %vm573_vm4, %v566_v40  ;;  %800 = vmatmul.mubr.msk.f32.vlgmr.msra.gmra.mrb[12].mxu1 %vm573_vm4, %v566_v40 }
 0x2aa   :  { %v643_v42 = vpop.f32.mrb[12].mxu0  ;;  %v714_v43 = vpop.f32.mrb[12].mxu1 }
 0x2ab   :  { %v644_v44 = vadd.f32 %v643_v42, %v571_v41  ;;  %v645_v45 = vpop.f32.mrb[13].mxu0  ;;  %v715_v46 = vadd.f32 %v714_v43, %v571_v41  ;;  %v716_v47 = vpop.f32.mrb[13].mxu1 }
 0x2ac   :  { %v646_v48 = vadd.f32 %v645_v45, %v571_v41  ;;  %v717_v49 = vadd.f32 %v716_v47, %v571_v41 }
 0x2ae   :  { %v723_v50 = vcombine.low %v644_v44, %v646_v48  ;;  %v724_v51 = vcombine.low %v715_v46, %v717_v49 }
 0x2b0   :  { %v727_v52 = vsub.f32 %v969_v28, %v723_v50  ;;  %v728_v53 = vsub.f32 %v974_v29, %v724_v51 }
 0x2b2   :  { %v729_v54 = vmul.f32 %v727_v52, %v727_v52  ;;  %v730_v55 = vmul.f32 %v728_v53, %v728_v53 }
 0x2b4   :  { %v733_v56 = vcombine.high %v729_v54, %v729_v54  ;;  %v734_v57 = vcombine.high %v730_v55, %v730_v55  ;;  %v737_v58 = vsel %vm359_vm2, %v729_v54, 0.0  ;;  %v740_v61 = vsel %vm359_vm2, %v730_v55, 0.0 }
 0x2b6   :  { %v738_v59 = vsel %vm359_vm2, %v733_v56, 0.0  ;;  %v742_v63 = vsel %vm359_vm2, %v734_v57, 0.0 }
 0x2b7   :  { %v739_v60 = vadd.f32 %v738_v59, %v737_v58 }
 0x2b9   :  { %v741_v62 = vadd.f32 %v740_v61, %v739_v60 }
 0x2bb   :  { %v743_v0 = vadd.f32 %v742_v63, %v741_v62 }
 0x2bd   :  { %744 = vadd.xlane.f32.xlu0 %v743_v0 }
 0x34a   :  { %v745_v1 = vpop.xlane.xlu0 %744 }
 0x34b   :  { %v746_v28 = vrot.slane %v745_v1, 4 }
 0x34d   :  { %v747_v2 = vadd.f32 %v746_v28, %v745_v1 }
 0x34f   :  { %v748_v29 = vrot.slane %v747_v2, 2 }
 0x351   :  { %v749_v3 = vadd.f32 %v748_v29, %v747_v2 }
 0x353   :  { %v750_v5 = vrot.slane %v749_v3, 1 }
 0x355   :  { %v751_v6 = vadd.f32 %v750_v5, %v749_v3 }
 0x357   :  { %833 = vpush %v751_v6 }
 0x388   :  { %s834_s29 = spop %833 }
 0x389   :  { %v753_v7 = vstv %s834_s29 }
 0x38a   :  { %756 = vst.msk [vmem:[#allocation2] sm:$0x1] %vm755_vm5, %v753_v7 }
 0x38b   :  { %856 = shalt.err (!%p853_p4)
}
 0x38c   :  { %s857_s11 = scalar_lea.hbm %s1045_s7, 16 }
 0x38d   :  { %p858_p5 = scmp.ne.s32.totalorder %s1045_s7, %s857_s11  ;;  %p861_p6 = scmp.lt.u32.totalorder %s857_s11, %s1045_s7 }
 0x38f   :  { %p863_p7 = pnand %p861_p6, %p858_p5 }
 0x391   :  { %866 = shalt.err (!%p863_p7)
}
 0x392   :  { %766 = dma.vmem_to_hbm [thread:$0]  %s764_s28, 16, %s1045_s7, [#allocation3]  }
 0x393   :  { %867 = dma.done.wait [#allocation3], 16  }
 0x394   :  { %868 = vsyncadd [#allocation3], 4294967280 }
 0x395   :  { %770 = vsyncpa [#allocation3], 1 }

</bundles_post_ra>
